<compile_context>
chip_gen: v5e
topology: v5e:2x2
jax: 0.10.0
libtpu: 0.0.40
codegen_flags: <defaults>
</compile_context>

<pallas_src>
import functools

import jax
import jax.numpy as jnp
from jax.experimental import pallas as pl
from jax.experimental.pallas import tpu as pltpu


# ---------------------------------------------------------------------------
# pe table construction (plain JAX glue; matches the torch __init__ math)
# ---------------------------------------------------------------------------
def make_pe_table(embed_dim: int, max_len: int) -> jnp.ndarray:
    assert embed_dim % 2 == 0
    pos = jnp.arange(max_len, dtype=jnp.float32)[:, None]          # (max_len, 1)
    half = jnp.arange(embed_dim // 2, dtype=jnp.float32)[None, :]  # (1, D/2)
    freq = jnp.power(10000.0, -2.0 * half / embed_dim)             # (1, D/2)
    angles = pos * freq                                            # (max_len, D/2)
    # interleave: pe[:, 2i] = sin, pe[:, 2i+1] = cos
    pe = jnp.stack([jnp.sin(angles), jnp.cos(angles)], axis=-1)    # (max_len, D/2, 2)
    pe = pe.reshape(max_len, embed_dim)                            # (max_len, D)
    return pe[None, :, :]                                          # (1, max_len, D)


# ---------------------------------------------------------------------------
# Pallas kernels
# ---------------------------------------------------------------------------
def _pe_add_kernel(x_ref, pe_ref, o_ref):
    # eval / p == 0 path: broadcasted add only (pe has a size-1 row dim).
    o_ref[...] = (x_ref[...] + pe_ref[...]).astype(o_ref.dtype)


def _pe_add_dropout_kernel(seed_ref, x_ref, pe_ref, o_ref, *, dropout_p: float):
    # train path: add + inverted dropout.
    # Randomness: stateless per-element hash of (seed, global row, global col)
    # -> distinct mask per tile, no TPU-only stateful PRNG primitives.
    j = pl.program_id(0)   # column-block axis (outer)
    i = pl.program_id(1)   # row-block / batch axis (inner)
    r, c = x_ref.shape

    y = x_ref[...] + pe_ref[...]                                   # (r, c)

    row_l = jax.lax.broadcasted_iota(jnp.int32, (r, c), 0)
    col_l = jax.lax.broadcasted_iota(jnp.int32, (r, c), 1)
    grow = (row_l + i * r).astype(jnp.uint32)
    gcol = (col_l + j * c).astype(jnp.uint32)
    seed = seed_ref[0].astype(jnp.uint32)

    # splitmix-style avalanche hash (all uint32, wraps mod 2^32)
    h = gcol * jnp.uint32(0x9E3779B1) + grow * jnp.uint32(0x85EBCA77) + seed
    h = h ^ (h >> 16)
    h = h * jnp.uint32(0x7FEB352D)
    h = h ^ (h >> 15)
    h = h * jnp.uint32(0x846CA68B)
    h = h ^ (h >> 16)

    # low 23 bits -> uniform float in [0, 1)
    u = (h & jnp.uint32(0x7FFFFF)).astype(jnp.int32).astype(jnp.float32)
    u = u * (1.0 / float(1 << 23))

    keep_prob = 1.0 - dropout_p
    keep = u < keep_prob
    o_ref[...] = jnp.where(keep, y * (1.0 / keep_prob),
                           jnp.zeros_like(y)).astype(o_ref.dtype)


# ---------------------------------------------------------------------------
# Tiling helpers + wrapper
# ---------------------------------------------------------------------------
def _pick_col_tile(total_cols: int, r_tile: int, itemsize: int,
                   target_bytes: int = 1 << 20) -> int:
    """Largest multiple of 128 that divides total_cols with r_tile*c*itemsize
    <= target_bytes (keeps double-buffered tiles well inside scoped VMEM,
    including v7x).  Falls back to the full width if cols isn't 128-aligned."""
    if total_cols % 128 != 0:
        # TODO(synk): pad the lane dim to a multiple of 128 for very large,
        # non-aligned S*D instead of using one full-width block.
        return total_cols
    cap = max(128, (target_bytes // max(1, r_tile * itemsize)) // 128 * 128)
    cap = min(cap, total_cols)
    t = cap
    while t >= 128:
        if total_cols % t == 0:
            return t
        t -= 128
    return 128


def positional_encoding_forward(x, pe_table, *, dropout_p=0.1, training=True,
                                seed=0):
    """x: (N, S, D).  pe_table: (1, max_len, D).  Returns (N, S, D)."""
    N, S, D = x.shape
    cols = S * D
    x2d = x.reshape(N, cols)
    pe2d = pe_table[:, :S, :].reshape(1, cols).astype(x.dtype)

    # Row tile: full batch when small / not 8-aligned, else 8-row tiles.
    r_tile = 8 if (N % 8 == 0) else N
    c_tile = _pick_col_tile(cols, r_tile, jnp.dtype(x.dtype).itemsize)
    grid = (cols // c_tile, N // r_tile)   # (col blocks OUTER, row blocks inner)

    out_shape = jax.ShapeDtypeStruct((N, cols), x.dtype)
    cparams = pltpu.CompilerParams(
        dimension_semantics=("parallel", "parallel"))

    if training and dropout_p > 0.0:
        seed_arr = jnp.asarray([seed], dtype=jnp.int32)
        kernel = functools.partial(_pe_add_dropout_kernel,
                                   dropout_p=float(dropout_p))
        grid_spec = pltpu.PrefetchScalarGridSpec(
            num_scalar_prefetch=1,
            grid=grid,
            in_specs=[
                pl.BlockSpec((r_tile, c_tile), lambda j, i, s: (i, j)),  # x
                pl.BlockSpec((1, c_tile), lambda j, i, s: (0, j)),       # pe
            ],
            out_specs=pl.BlockSpec((r_tile, c_tile), lambda j, i, s: (i, j)),
        )
        out2d = pl.pallas_call(
            kernel, out_shape=out_shape, grid_spec=grid_spec,
            compiler_params=cparams,
        )(seed_arr, x2d, pe2d)
    else:
        grid_spec = pltpu.PrefetchScalarGridSpec(
            num_scalar_prefetch=0,
            grid=grid,
            in_specs=[
                pl.BlockSpec((r_tile, c_tile), lambda j, i: (i, j)),  # x
                pl.BlockSpec((1, c_tile), lambda j, i: (0, j)),       # pe
            ],
            out_specs=pl.BlockSpec((r_tile, c_tile), lambda j, i: (i, j)),
        )
        out2d = pl.pallas_call(
            _pe_add_kernel, out_shape=out_shape, grid_spec=grid_spec,
            compiler_params=cparams,
        )(x2d, pe2d)

    return out2d.reshape(N, S, D)


# ---------------------------------------------------------------------------
# Main
# ---------------------------------------------------------------------------
if __name__ == "__main__":
    N, S, D = 2, 8, 32
    max_len = 64
    dropout_p = 0.1

    key = jax.random.PRNGKey(0)
    x = jax.random.normal(key, (N, S, D), dtype=jnp.float32)

    pe_table = make_pe_table(D, max_len)
    ref = x + pe_table[:, :S, :]

    # 1) deterministic path (eval / p == 0): must equal x + pe exactly
    out_eval = positional_encoding_forward(x, pe_table, dropout_p=dropout_p,
                                           training=False)
    out_eval = jax.block_until_ready(out_eval)
    assert out_eval.shape == (N, S, D)
    assert jnp.allclose(out_eval, ref, atol=1e-6), "eval path mismatch"

    # 2) training path with dropout (stochastic; check structural invariants)
    out_train = positional_encoding_forward(x, pe_table, dropout_p=dropout_p,
                                            training=True, seed=1234)
    out_train = jax.block_until_ready(out_train)
    assert out_train.shape == (N, S, D)
    assert bool(jnp.all(jnp.isfinite(out_train)))
    # every surviving element equals ref / (1 - p); dropped elements are 0
    scaled_ref = ref / (1.0 - dropout_p)
    is_kept = jnp.abs(out_train - scaled_ref) < 1e-5
    is_dropped = jnp.abs(out_train) < 1e-12
    assert bool(jnp.all(is_kept | is_dropped)), "dropout output structure mismatch"

    print("KERNEL_OK")
</pallas_src>

<mosaic_0001>
module attributes {stable_mosaic.version = 11 : i64} {
  func.func @_pe_add_kernel(%arg0: i32, %arg1: i32, %arg2: memref<2x256xf32, #tpu.memory_space<vmem>>, %arg3: memref<1x256xf32, #tpu.memory_space<vmem>>, %arg4: memref<2x256xf32, #tpu.memory_space<vmem>>) attributes {dimension_semantics = [#tpu.dimension_semantics<parallel>, #tpu.dimension_semantics<parallel>], iteration_bounds = array<i64: 1, 1>, scalar_prefetch = 0 : i64, scratch_operands = 0 : i64, tpu.core_type = #tpu.core_type<tc>, window_params = [{transform_indices = @transform_0, window_bounds = array<i64: 2, 256>}, {transform_indices = @transform_1, window_bounds = array<i64: 1, 256>}, {transform_indices = @transform_2, window_bounds = array<i64: 2, 256>}]} {
    %c0 = arith.constant 0 : index
    %c0_0 = arith.constant 0 : index
    %0 = vector.load %arg2[%c0, %c0_0] : memref<2x256xf32, #tpu.memory_space<vmem>>, vector<2x256xf32>
    %c0_1 = arith.constant 0 : index
    %c0_2 = arith.constant 0 : index
    %1 = vector.load %arg3[%c0_1, %c0_2] : memref<1x256xf32, #tpu.memory_space<vmem>>, vector<1x256xf32>
    %2 = vector.broadcast %1 : vector<1x256xf32> to vector<2x256xf32>
    %3 = arith.addf %0, %2 : vector<2x256xf32>
    %c0_3 = arith.constant 0 : index
    %c0_4 = arith.constant 0 : index
    %4 = vector.load %arg4[%c0_3, %c0_4] : memref<2x256xf32, #tpu.memory_space<vmem>>, vector<2x256xf32>
    tpu.vector_store %arg4[%c0_3, %c0_4], %3 {strides = array<i32>} : memref<2x256xf32, #tpu.memory_space<vmem>>, vector<2x256xf32>,
    return
  }
  func.func @transform_0(%arg0: i32, %arg1: i32) -> (i32, i32) {
    %c0_i32 = arith.constant 0 : i32
    return %arg1, %arg0 : i32, i32
  }
  func.func @transform_1(%arg0: i32, %arg1: i32) -> (i32, i32) {
    %c0_i32 = arith.constant 0 : i32
    %c0_i32_0 = arith.constant 0 : i32
    return %c0_i32, %arg0 : i32, i32
  }
  func.func @transform_2(%arg0: i32, %arg1: i32) -> (i32, i32) {
    %c0_i32 = arith.constant 0 : i32
    return %arg1, %arg0 : i32, i32
  }
}

</mosaic_0001>

<bundles_post_ra>
// kernel: tpu_custom_call.1
= control target key start
LH: loop header
LB: loop body
LE: loop exit
PB: predicated region body
PF: predicated region fallthrough
CT: control target
= control target key end

     0   :  { %7 = vsyncpa [#allocation3], 0  ;;  %s177_s0 = inlined_call_operand.hbm [shape: f32[2,256], index: 0, kind: input, shape index: {}]   ;;  %s178_s1 = inlined_call_operand.hbm [shape: f32[1,256], index: 1, kind: input, shape index: {}]   ;;  %s179_s2 = inlined_call_operand.hbm [shape: f32[2,256], index: 2, kind: output, shape index: {}]  }
   0x1   :  { %8 = vsyncpa [#allocation6], 0 }
   0x2   :  { %9 = vsyncpa [#allocation4], 0  ;;  %s15_s11 = sshll.u32 %s177_s0, 4  ;;  %s150_s12 = smov [#allocation2]   ;;  %s16_s11 = int_to_ptr.hbm [resolvable:$true] %s15_s11 }
   0x3   :  { %s17_s13 = sshll.u32 %s150_s12, 4  ;;  %s26_s16 = sshll.u32 %s178_s1, 4  ;;  %s18_s13 = int_to_ptr.vmem [resolvable:$true] %s17_s13  ;;  %s27_s16 = int_to_ptr.hbm [resolvable:$true] %s26_s16 }
   0x4   :  { %20 = dma.hbm_to_vmem [thread:$0]  %s16_s11, 64, %s18_s13, [#allocation3]  }
   0x5   :  { %s151_s17 = smov [#allocation5]  }
   0x6   :  { %s28_s18 = sshll.u32 %s151_s17, 4  ;;  %s29_s18 = int_to_ptr.vmem [resolvable:$true] %s28_s18 }
   0x7   :  { %31 = dma.hbm_to_vmem [thread:$0]  %s27_s16, 32, %s29_s18, [#allocation6]  }
   0x8   :  { %144 = dma.done.wait [#allocation3], 64  }
   0x9   :  { %145 = vsyncadd [#allocation3], 4294967232 }
   0xa   :  { %146 = dma.done.wait [#allocation6], 32  }
   0xb   :  { %147 = vsyncadd [#allocation6], 4294967264  ;;  %v41_v0 = vld [vmem:[#allocation5] sm:$0x3]  ;;  %vm46_vm0 = vcmask 1041408   ;;  %s152_s0 = smov [#allocation7]  }
   0xc   :  { %v43_v1 = vperm.slane %v41_v0, 0  ;;  %v44_v2 = vperm.slane %v41_v0, 1  ;;  %v40_v3 = vld [vmem:[#allocation2] sm:$0xf]  ;;  %s56_s19 = sshll.u32 %s152_s0, 4  ;;  %s58_s21 = sshll.u32 %s179_s2, 4  ;;  %s57_s19 = int_to_ptr.vmem [resolvable:$true] %s56_s19  ;;  %s59_s21 = int_to_ptr.hbm [resolvable:$true] %s58_s21 }
   0xe   :  { %v45_v4 = vrot.slane %v44_v2, 6 }
  0x10   :  { %v47_v5 = vsel %vm46_vm0, %v43_v1, %v45_v4 }
  0x11   :  { %v49_v6 = vadd.f32 %v47_v5, %v40_v3 }
  0x13   :  { %50 = vst [vmem:[#allocation7] sm:$0xf] %v49_v6 }
  0x14   :  { %61 = dma.vmem_to_hbm [thread:$0]  %s57_s19, 64, %s59_s21, [#allocation4]  }
  0x15   :  { %148 = dma.done.wait [#allocation4], 64  }
  0x16   :  { %149 = vsyncadd [#allocation4], 4294967232 }
  0x17   :  { %66 = vsyncpa [#allocation3], 1 }
  0x18   :  { %67 = vsyncpa [#allocation6], 1 }
  0x19   :  { %68 = vsyncpa [#allocation4], 1 }

</bundles_post_ra>
